<compile_context>
chip_gen: v7x
topology: tpu7x:2x2x1
jax: 0.10.0
libtpu: 0.0.40
codegen_flags: <defaults>
</compile_context>

<pallas_src>
import jax
import jax.numpy as jnp
from jax.experimental import pallas as pl
from jax.experimental.pallas import tpu as pltpu


def _shuffle_copy_kernel(x_ref, o_ref):
    # Pure copy: the channel-shuffle permutation lives entirely in the output
    # BlockSpec index_map (strided scatter done by the DMA engine), not here.
    o_ref[...] = x_ref[...]


def _pick_row_tile(hw_rows: int, cpg: int, lane: int, itemsize: int) -> int:
    """Pick an hw-row tile: a divisor of hw_rows keeping one block ~<= 2 MiB,
    preferring sublane-aligned (multiple-of-8) tiles."""
    target_elems = (2 * 1024 * 1024) // itemsize
    max_rows = max(1, target_elems // max(1, cpg * lane))
    if hw_rows <= max_rows:
        return hw_rows
    divisors = [d for d in range(1, max_rows + 1) if hw_rows % d == 0]
    aligned = [d for d in divisors if d % 8 == 0]
    return max(aligned) if aligned else max(divisors)


def channel_shuffle(x: jax.Array, groups: int) -> jax.Array:
    """x: (B, C, H, W) NCHW.  Returns channel-shuffled array, same shape/dtype."""
    b, c, h, w = x.shape
    assert c % groups == 0, "num_channels must be divisible by groups"
    cpg = c // groups
    hw = h * w

    # Split HW into (hw_rows, lane): lane-dense last dim (multiple of 128) when
    # possible, otherwise the full HW (block == full array dim is always legal).
    # TODO(synk): pad HW to a multiple of 128 for lane-dense DMA when HW % 128 != 0.
    lane = 128 if hw % 128 == 0 else hw
    hw_rows = hw // lane
    itemsize = jnp.dtype(x.dtype).itemsize
    row_tile = _pick_row_tile(hw_rows, cpg, lane, itemsize)
    n_row_tiles = hw_rows // row_tile

    # Input viewed as (B, C, hw_rows, lane); output produced directly in the
    # shuffled view (B, CPG, G, hw_rows, lane) so flattening (CPG, G) -> C
    # afterwards is a free reshape yielding out_channel = j*G + i.
    x4 = x.reshape(b, c, hw_rows, lane)

    out5 = pl.pallas_call(
        _shuffle_copy_kernel,
        out_shape=jax.ShapeDtypeStruct((b, cpg, groups, hw_rows, lane), x.dtype),
        grid_spec=pltpu.PrefetchScalarGridSpec(
            num_scalar_prefetch=0,
            grid=(b, groups, n_row_tiles),
            in_specs=[
                # Input group i: channels [i*CPG, (i+1)*CPG) of one HW-row tile.
                pl.BlockSpec(
                    (1, cpg, row_tile, lane),
                    lambda bi, gi, ti: (bi, gi, ti, 0),
                ),
            ],
            # Same data lands at output[b, :, i, tile, :]; the size-1 group
            # axis is squeezed (None) so the VMEM-facing block stays a dense,
            # tile-aligned (CPG, row_tile, lane) slab and the channel stride
            # lives purely on the HBM side of the DMA.
            out_specs=pl.BlockSpec(
                (1, cpg, None, row_tile, lane),
                lambda bi, gi, ti: (bi, 0, gi, ti, 0),
            ),
        ),
        compiler_params=pltpu.CompilerParams(
            dimension_semantics=("parallel", "parallel", "parallel"),
            vmem_limit_bytes=32 * 1024 * 1024,
        ),
    )(x4)

    return out5.reshape(b, c, h, w)


def channel_shuffle_ref(x: jax.Array, groups: int) -> jax.Array:
    b, c, h, w = x.shape
    cpg = c // groups
    return (
        x.reshape(b, groups, cpg, h, w)
        .transpose(0, 2, 1, 3, 4)
        .reshape(b, c, h, w)
    )


if __name__ == "__main__":
    key = jax.random.PRNGKey(0)
    B, C, H, W = 2, 4, 16, 16
    GROUPS = 2

    x = jax.random.normal(key, (B, C, H, W), dtype=jnp.float32)

    out = channel_shuffle(x, GROUPS)
    out = jax.block_until_ready(out)

    ref = channel_shuffle_ref(x, GROUPS)
    assert out.shape == ref.shape and out.dtype == ref.dtype
    assert jnp.allclose(out, ref), "mismatch vs reference channel shuffle"

    print("KERNEL_OK")
</pallas_src>

<mosaic_0001>
module attributes {stable_mosaic.version = 11 : i64} {
  func.func @_shuffle_copy_kernel(%arg0: i32, %arg1: i32, %arg2: i32, %arg3: memref<1x2x2x128xf32, #tpu.memory_space<vmem>>, %arg4: memref<1x2x1x2x128xf32, #tpu.memory_space<vmem>>) attributes {dimension_semantics = [#tpu.dimension_semantics<parallel>, #tpu.dimension_semantics<parallel>, #tpu.dimension_semantics<parallel>], iteration_bounds = array<i64: 2, 2, 1>, scalar_prefetch = 0 : i64, scratch_operands = 0 : i64, tpu.core_type = #tpu.core_type<tc>, window_params = [{transform_indices = @transform_0, window_bounds = array<i64: 1, 2, 2, 128>}, {transform_indices = @transform_1, window_bounds = array<i64: 1, 2, 1, 2, 128>}]} {
    %c0 = arith.constant 0 : index
    %c0_0 = arith.constant 0 : index
    %c0_1 = arith.constant 0 : index
    %c0_2 = arith.constant 0 : index
    %0 = vector.load %arg3[%c0, %c0_0, %c0_1, %c0_2] : memref<1x2x2x128xf32, #tpu.memory_space<vmem>>, vector<1x2x2x128xf32>
    %c0_3 = arith.constant 0 : index
    %c0_4 = arith.constant 0 : index
    %c0_5 = arith.constant 0 : index
    %c0_6 = arith.constant 0 : index
    %c0_7 = arith.constant 0 : index
    %1 = vector.load %arg4[%c0_3, %c0_4, %c0_5, %c0_6, %c0_7] : memref<1x2x1x2x128xf32, #tpu.memory_space<vmem>>, vector<1x2x1x2x128xf32>
    %2 = vector.shape_cast %1 : vector<1x2x1x2x128xf32> to vector<1x2x2x128xf32>
    %3 = vector.shape_cast %0 : vector<1x2x2x128xf32> to vector<1x2x1x2x128xf32>
    tpu.vector_store %arg4[%c0_3, %c0_4, %c0_5, %c0_6, %c0_7], %3 {strides = array<i32>} : memref<1x2x1x2x128xf32, #tpu.memory_space<vmem>>, vector<1x2x1x2x128xf32>,
    return
  }
  func.func @transform_0(%arg0: i32, %arg1: i32, %arg2: i32) -> (i32, i32, i32, i32) {
    %c0_i32 = arith.constant 0 : i32
    %c0_i32_0 = arith.constant 0 : i32
    return %arg0, %arg1, %arg2, %c0_i32 : i32, i32, i32, i32
  }
  func.func @transform_1(%arg0: i32, %arg1: i32, %arg2: i32) -> (i32, i32, i32, i32, i32) {
    %c0_i32 = arith.constant 0 : i32
    %c0_i32_0 = arith.constant 0 : i32
    %c0_i32_1 = arith.constant 0 : i32
    return %arg0, %c0_i32, %arg1, %arg2, %c0_i32_0 : i32, i32, i32, i32, i32
  }
}

</mosaic_0001>

<bundles_post_ra>
// kernel: tpu_custom_call.1
= control target key start
LH: loop header
LB: loop body
LE: loop exit
PB: predicated region body
PF: predicated region fallthrough
CT: control target
= control target key end

     0   :  { %6 = vsyncpa [#allocation3], 0  ;;  %s721_s0 = inlined_call_operand.hbm [shape: f32[2,4,2,128], index: 0, kind: input, shape index: {}]   ;;  %s722_s1 = inlined_call_operand.hbm [shape: f32[2,2,2,2,128], index: 1, kind: output, shape index: {}]  }
   0x1   :  { %8 = vsyncpa [#allocation3 + $0x1], 0 }
   0x2   :  { %9 = vsyncpa [#allocation4], 0 }
   0x3   :  { %11 = vsyncpa [#allocation4 + $0x1], 0  ;;  %s526_s6 = smov 0   ;;  %s528_s7 = smov 0  }
   0x4   :  { %s530_s8 = smov 0   ;;  %s532_s9 = smov 0  }
   0x5   :  { %s534_s10 = smov 0   ;;  %s536_s11 = smov 0  }
   0x6   :  { %s538_s12 = smov 0   ;;  %s540_s13 = smov 0  }
   0x7 LB: > { %s280_s14 = sadd.s32 4294967295, %s507_s13   ;;  %s281_s15 = sadd.s32 4294967294, %s507_s13   ;;  %s507_s13 = sphi %s540_s13, %s17_s13   ;;  %s503_s12 = sphi %s538_s12, %s737_s12   ;;  %s499_s11 = sphi %s536_s11, %s736_s11   ;;  %s495_s10 = sphi %s534_s10, %s735_s10   ;;  %s491_s9 = sphi %s532_s9, %s734_s9   ;;  %s487_s8 = sphi %s530_s8, %s733_s8   ;;  %s483_s7 = sphi %s528_s7, %s732_s7   ;;  %s479_s6 = sphi %s526_s6, %s731_s6  }
   0x8   : > { %s32_s16 = sadd.s32 1, %s499_s11  ;;  %s36_s17 = sadd.s32 1, %s503_s12 }
   0x9   : > { %p34_p0 = scmp.ge.s32.totalorder %s32_s16, 2  ;;  %s47_s18 = sadd.s32 1, %s487_s8 }
   0xa   : > { %p54_p1 = scmp.ne.s32.totalorder %s487_s8, %s483_s7  ;;  %p55_p2 = scmp.eq.s32.totalorder %s507_s13, 0 }
   0xb   : > { %s739_s16 = smov (%p34_p0, %s32_s16), 0  ;;  %s741_s17 = smov (!%p34_p0, %s36_s17), %s503_s12 }
   0xc   : > { %s41_s19 = ssub.s32 %s499_s11, %s739_s16  ;;  %p579_p3 = por %p55_p2, %p54_p1 }
   0xd   : > { %p38_p4 = scmp.ge.s32.totalorder %s741_s17, 2  ;;  %p60_p5 = scmp.ne.s32.totalorder %s483_s7, %s479_s6 }
   0xe   : > { %p61_p6 = scmp.eq.s32.totalorder %s280_s14, 0  ;;  %p88_p7 = scmp.eq.s32.totalorder %s280_s14, 3 }
   0xf   : > { %s743_s17 = smov (%p38_p4, %s741_s17), 0  ;;  %p94_p10 = scmp.eq.s32.totalorder %s281_s15, 3 }
  0x10   : > { %p587_p8 = por %p61_p6, %p60_p5  ;;  %p591_p9 = por %p88_p7, %p54_p1 }
  0x11   : > { %s40_s23 = ssub.s32 %s503_s12, %s743_s17  ;;  %p597_p12 = por %p94_p10, %p60_p5 }
  0x12   : > { %s726_s22 = scalar_select %p591_p9, 1, 0 }
  0x13   : > { %s42_s24 = sor.u32 %s41_s19, %s40_s23  ;;  %p308_p13 = scmp.lt.s32.totalorder %s507_s13, 4 }
  0x14   : > { %p45_p11 = scmp.eq.s32.totalorder %s42_s24, 0  ;;  %s114_s26 = sand.u32 1, %s487_s8  }
  0x15   : > { %s727_s25 = scalar_select %p597_p12, 1, 0 }
  0x16   : > { %s604_s27 = scalar_select %p45_p11, %s487_s8, %s47_s18  }
  0x17   : > { %s284_s28 = sshll.u32 %s114_s26, 2  ;;  %s285_s29 = sshll.u32 %s499_s11, 1 }
  0x18   : > { %s286_s30 = sshll.u32 %s503_s12, 2  ;;  %s118_s2 = scalar_lea.vmem [#allocation2], %s284_s28 }
  0x19   : > { %s128_s3 = sshll.u32 %s118_s2, 4  ;;  %s125_s4 = sadd.s32 %s286_s30, %s285_s29  ;;  %s608_s3 = int_to_ptr.vmem [resolvable:$true] %s128_s3 }
  0x1a   : > { %s287_s5 = sshll.u32 %s125_s4, 5  ;;  %p612_p0 = pnand %p308_p13, %p579_p3 }
  0x1b   : > { %s619_s18 = scalar_lea.hbm %s721_s0, %s287_s5  ;;  %s621_s23 = scalar_lea.sflag [#allocation3], %s114_s26 }
  0x1c   : > { %s379_s24 = scalar_lea.hbm %s619_s18, 64  ;;  %p381_p2 = pneg %p612_p0 }
  0x1d   : > { %p380_p1 = scmp.ne.s32.totalorder %s619_s18, %s379_s24  ;;  %s384_s29 = scalar_lea.hbm %s721_s0, 256 }
  0x1e   : > { %p385_p5 = scmp.lt.u32.totalorder %s619_s18, %s721_s0  ;;  %p386_p6 = scmp.lt.u32.totalorder %s384_s29, %s379_s24 }
  0x1f   : > { %p382_p3 = pnand %p381_p2, %p380_p1  ;;  %p388_p10 = scmp.lt.u32.totalorder %s379_s24, %s619_s18 }
  0x20   : > { %p387_p7 = por %p386_p6, %p385_p5 }
  0x21   : > { %p383_p4 = pneg %p382_p3 }
  0x22   : > { %p389_p11 = por %p388_p10, %p387_p7 }
  0x24   : > { %p390_p13 = pnand %p389_p11, %p383_p4 }
  0x26   : > { %393 = shalt.err (!%p390_p13)
}
  0x27   : > { %s394_s26 = scalar_lea.vmem %s608_s3, 64  ;;  %s509_s4 = smov [#allocation2]  }
  0x28   : > { %p395_p1 = scmp.ne.s32.totalorder %s608_s3, %s394_s26  ;;  %s399_s5 = sshll.u32 %s509_s4, 4  ;;  %s400_s5 = int_to_ptr.vmem [resolvable:$false] %s399_s5 }
  0x29   : > { %s401_s15 = scalar_lea.vmem %s400_s5, 128  ;;  %p402_p9 = scmp.lt.s32.totalorder %s608_s3, %s400_s5 }
  0x2a   : > { %p397_p3 = pnand %p395_p1, %p381_p2  ;;  %p403_p5 = scmp.lt.s32.totalorder %s401_s15, %s394_s26 }
  0x2c   : > { %p398_p12 = pneg %p397_p3  ;;  %p404_p6 = por %p403_p5, %p402_p9 }
  0x2e   : > { %p405_p7 = pnand %p404_p6, %p398_p12 }
  0x30   : > { %408 = shalt.err (!%p405_p7)
}
  0x31   : > { %s510_s19 = smov 32   ;;  %s511_s24 = smov 2  }
  0x32   : > { %303 = dma.hbm_to_vmem [thread:$0]  (!%p612_p0), %s619_s18, 64, %s608_s3, %s621_s23, %s510_s19, %s510_s19, %s511_s24  }
  0x33   : > { %p288_p2 = scmp.ge.s32.totalorder %s507_s13, 1  ;;  %p136_p4 = scmp.lt.s32.totalorder %s507_s13, 5 }
  0x35   : > { %p137_p10 = pnand %p288_p2, %p136_p4 }
  0x36   : > { %s652_s20 = sand.u32 (!%p137_p10), 1, %s483_s7  }
  0x37   : > { %140 = sbr.rel (%p137_p10) target bundleno = 92 (0x5c), region = 24  ;;  %s289_s28 = sshll.u32 (!%p137_p10), %s652_s20, 2 }
  0x38   : > { %s143_s29 = scalar_lea.sflag (!%p137_p10), [#allocation3], %s652_s20  ;;  %s146_s30 = scalar_lea.vmem (!%p137_p10), [#allocation2], %s289_s28 }
  0x3e   : > { %470 = dma.done.wait (%p587_p8), %s143_s29, 64  }
  0x3f   : > { %472 = vsyncadd (%p587_p8), %s143_s29, 4294967232  ;;  %s164_s3 = scalar_lea.vmem [#allocation5], %s289_s28  ;;  %s292_s18 = sshll.u32 %s495_s10, 2  ;;  %v166_v0 = vld [vmem:[%s146_s30] sm:$0xf]  }
  0x40   : > { %s186_s14 = sshll.u32 %s164_s3, 4  ;;  %s183_s23 = sadd.s32 %s491_s9, %s292_s18  ;;  %168 = vst [vmem:[%s164_s3] sm:$0xf] %v166_v0   ;;  %s662_s14 = int_to_ptr.vmem [resolvable:$true] %s186_s14 }
  0x41   : > { %s293_s2 = sshll.u32 %s183_s23, 5  ;;  %s171_s21 = scalar_lea.sflag [#allocation4], %s652_s20 }
  0x42   : > { %s667_s5 = scalar_lea.hbm %s722_s1, %s293_s2  ;;  %s409_s15 = scalar_lea.vmem %s662_s14, 64 }
  0x43   : > { %p410_p8 = scmp.ne.s32.totalorder %s662_s14, %s409_s15  ;;  %p729_p9 = scmp.ne.s32.totalorder %s726_s22, 0 }
  0x44   : > { %s512_s9 = smov [#allocation5]  }
  0x45   : > { %p411_p12 = pnand %p410_p8, %p729_p9  ;;  %s413_s10 = sshll.u32 %s512_s9, 4  ;;  %s414_s10 = int_to_ptr.vmem [resolvable:$false] %s413_s10 }
  0x46   : > { %s415_s19 = scalar_lea.vmem %s414_s10, 128  ;;  %p416_p11 = scmp.lt.s32.totalorder %s662_s14, %s414_s10 }
  0x47   : > { %p412_p0 = pneg %p411_p12  ;;  %p417_p13 = scmp.lt.s32.totalorder %s415_s19, %s409_s15 }
  0x49   : > { %p418_p1 = por %p417_p13, %p416_p11 }
  0x4b   : > { %p419_p3 = pnand %p418_p1, %p412_p0 }
  0x4d   : > { %422 = shalt.err (!%p419_p3)
}
  0x4e   : > { %s423_s24 = scalar_lea.hbm %s667_s5, 64  ;;  %s427_s30 = scalar_lea.hbm %s722_s1, 256 }
  0x4f   : > { %p424_p5 = scmp.ne.s32.totalorder %s667_s5, %s423_s24  ;;  %p428_p2 = scmp.lt.u32.totalorder %s667_s5, %s722_s1 }
  0x50   : > { %p429_p4 = scmp.lt.u32.totalorder %s427_s30, %s423_s24  ;;  %p431_p8 = scmp.lt.u32.totalorder %s423_s24, %s667_s5 }
  0x51   : > { %p425_p6 = pnand %p424_p5, %p729_p9 }
  0x52   : > { %p430_p10 = por %p429_p4, %p428_p2 }
  0x53   : > { %p426_p7 = pneg %p425_p6 }
  0x54   : > { %p432_p12 = por %p431_p8, %p430_p10 }
  0x56   : > { %p433_p0 = pnand %p432_p12, %p426_p7 }
  0x58   : > { %436 = shalt.err (!%p433_p0)
}
  0x59   : > { %s513_s23 = smov 32   ;;  %s514_s2 = smov 64  }
  0x5a   : > { %s515_s26 = smov 2  }
  0x5b   : > { %298 = dma.vmem_to_hbm [thread:$0]  (%p729_p9), %s662_s14, 64, %s667_s5, %s171_s21, %s513_s23, %s514_s2, %s515_s26  }
  0x5c PF: > { %p309_p11 = scmp.ge.s32.totalorder %s507_s13, 2  ;;  %s201_s4 = sand.u32 1, %s479_s6  }
  0x5d   : > { %p730_p13 = scmp.ne.s32.totalorder %s727_s25, 0  ;;  %s202_s15 = scalar_lea.sflag [#allocation4], %s201_s4 }
  0x5f   : > { %p305_p1 = pnand %p309_p11, %p730_p13 }
  0x61   : > { %474 = dma.done.wait (!%p305_p1), %s202_s15, 64  }
  0x62   : > { %476 = vsyncadd (!%p305_p1), %s202_s15, 4294967232  ;;  %s17_s13 = sadd.s32 1, %s507_s13   ;;  %s731_s6 = smov %s483_s7 }
  0x63   : > { %p14_p3 = scmp.ge.s32.totalorder %s17_s13, 6   ;;  %s732_s7 = smov %s487_s8 }
  0x64   : > { %s733_s8 = smov %s604_s27  ;;  %s734_s9 = smov %s499_s11 }
  0x65   : > { %s735_s10 = smov %s503_s12  ;;  %s736_s11 = smov %s739_s16 }
  0x66   : > { %s737_s12 = smov %s743_s17  ;;  %16 = sbr.rel (!%p14_p3) target bundleno = 7 (0x7), region = 69 }
  0x6d   :  { %207 = vsyncpa [#allocation3], 1 }
  0x6e   :  { %209 = vsyncpa [#allocation3 + $0x1], 1 }
  0x6f   :  { %210 = vsyncpa [#allocation4], 1 }
  0x70   :  { %212 = vsyncpa [#allocation4 + $0x1], 1 }

</bundles_post_ra>
